<compile_context>
chip_gen: v7x
topology: tpu7x:2x2x1
jax: 0.10.0
libtpu: 0.0.40
codegen_flags: <defaults>
</compile_context>

<pallas_src>
import functools

import jax
import jax.numpy as jnp
import numpy as np
from jax.experimental import pallas as pl
from jax.experimental.pallas import tpu as pltpu


# ----------------------------------------------------------------------------
# Fused Pallas kernel: conv(3x3,s2) + ReLU + 1x1 classifier + bilinear resize
# ----------------------------------------------------------------------------
def _fused_seg_kernel(pt_ref, w1_ref, w2_ref, b2_ref, rt_ref, out_ref, *,
                      n_batch, hw_in):
    """Whole batch in one step; pixels (all samples) live on the lane axis.

      featT   = relu(W1aug @ PTaug)           (C_mid , N*Ho*Wo)   lane = 128
      logitsT = W2 @ featT + b2               (n_cls , N*Ho*Wo)
      fold    : (n_cls, N*HoWo) -> (N*n_cls, HoWo) via static slices
      outT    = fold(logitsT) @ RT            (N*n_cls , H*W)     lane = 256
    """
    # backbone conv (as matmul over im2col patches) + folded bias + ReLU
    feat = jnp.dot(w1_ref[...], pt_ref[...],
                   preferred_element_type=jnp.float32)
    feat = jnp.maximum(feat, 0.0).astype(jnp.bfloat16)

    # 1x1 classifier
    logits = jnp.dot(w2_ref[...], feat, preferred_element_type=jnp.float32)
    logits = logits + b2_ref[...]                      # (n_cls, N*Ho*Wo), f32

    # fold batch from the lane axis onto the sublane axis: (N*n_cls, Ho*Wo)
    parts = [logits[:, i * hw_in:(i + 1) * hw_in] for i in range(n_batch)]
    lg = parts[0] if n_batch == 1 else jnp.concatenate(parts, axis=0)

    # bilinear resize as one dense matmul with the (Ho*Wo, H*W) Kronecker matrix
    out = jnp.dot(lg.astype(jnp.bfloat16), rt_ref[...],
                  preferred_element_type=jnp.float32)
    out_ref[...] = out.astype(out_ref.dtype)


def _fused_forward(pt_aug, w1_aug, w2, b2, rt, *, n_batch, hw_in, hw_out, n_cls):
    """pt_aug: (C_in*9+1, N*Ho*Wo) bf16. Returns out (N*n_cls, H*W) f32."""
    c_mid, k1 = w1_aug.shape
    kernel = functools.partial(_fused_seg_kernel, n_batch=n_batch, hw_in=hw_in)

    flops = 2 * (c_mid * k1 * n_batch * hw_in            # backbone conv
                 + n_cls * c_mid * n_batch * hw_in       # 1x1 classifier
                 + n_batch * n_cls * hw_in * hw_out)     # bilinear resize
    bytes_accessed = (pt_aug.size * pt_aug.dtype.itemsize
                      + w1_aug.size * w1_aug.dtype.itemsize
                      + w2.size * w2.dtype.itemsize
                      + b2.size * b2.dtype.itemsize
                      + rt.size * rt.dtype.itemsize
                      + n_batch * n_cls * hw_out * 4)

    return pl.pallas_call(
        kernel,
        out_shape=jax.ShapeDtypeStruct((n_batch * n_cls, hw_out), jnp.float32),
        grid=(1,),
        in_specs=[
            pl.BlockSpec(pt_aug.shape, lambda i: (0, 0)),   # patches (+ones row)
            pl.BlockSpec(w1_aug.shape, lambda i: (0, 0)),   # W1 (+bias column)
            pl.BlockSpec(w2.shape, lambda i: (0, 0)),       # W2 (1x1 conv)
            pl.BlockSpec(b2.shape, lambda i: (0, 0)),       # classifier bias
            pl.BlockSpec(rt.shape, lambda i: (0, 0)),       # resize matrix R^T
        ],
        out_specs=pl.BlockSpec((n_batch * n_cls, hw_out), lambda i: (0, 0)),
        compiler_params=pltpu.CompilerParams(
            dimension_semantics=("arbitrary",)),
        cost_estimate=pl.CostEstimate(flops=flops, transcendentals=0,
                                      bytes_accessed=bytes_accessed),
    )(pt_aug, w1_aug, w2, b2, rt)


# ----------------------------------------------------------------------------
# Glue: bilinear sampling matrices (NumPy cached) and batch-folded im2col
# ----------------------------------------------------------------------------
def _bilinear_matrix(out_size, in_size):
    """Row-stochastic 1-D resize matrix matching torch align_corners=False."""
    scale = in_size / out_size
    i = np.arange(out_size)
    real = np.maximum((i + 0.5) * scale - 0.5, 0.0)
    i0 = np.minimum(np.floor(real).astype(np.int64), in_size - 1)
    i1 = np.minimum(i0 + 1, in_size - 1)
    l1 = (real - i0).astype(np.float32)
    l0 = 1.0 - l1
    m = np.zeros((out_size, in_size), dtype=np.float32)
    m[np.arange(out_size), i0] += l0
    m[np.arange(out_size), i1] += l1
    return m


@functools.lru_cache(maxsize=None)
def _resize_matrix_t_np(out_h, out_w, in_h, in_w):
    """Transposed Kronecker resize matrix (NumPy), shape (in_h*in_w, out_h*out_w).

    TODO(synk): at realistic resolutions replace this dense Kronecker matrix
    with the separable out = A @ logits @ B^T form inside the kernel (the dense
    matrix does not fit v7x's 64 MiB VMEM and wastes FLOPs at scale).
    """
    a = _bilinear_matrix(out_h, in_h)              # (out_h, in_h)
    b = _bilinear_matrix(out_w, in_w)              # (out_w, in_w)
    return np.kron(a, b).T.astype(np.float32)      # cached as host NumPy


def _im2col_batch_folded(x_nchw, ksize, stride, pad):
    """NCHW -> (C*k*k, N*Ho*Wo); rows ordered (c,kh,kw), cols ordered (n,ho,wo).

    TODO(synk): at real segmentation resolutions move this into the kernel
    (halo BlockSpec / 9 accumulated strided matmuls) to avoid the k*k patch
    blowup in HBM; at the toy size it is negligible.
    """
    n, c, h, w = x_nchw.shape
    ho = (h + 2 * pad - ksize) // stride + 1
    wo = (w + 2 * pad - ksize) // stride + 1
    xp = jnp.pad(x_nchw, ((0, 0), (0, 0), (pad, pad), (pad, pad)))
    cols = []
    for kh in range(ksize):
        for kw in range(ksize):
            cols.append(xp[:, :, kh:kh + stride * ho:stride,
                           kw:kw + stride * wo:stride])      # (N, C, Ho, Wo)
    pt = jnp.stack(cols, axis=2)                             # (N, C, k*k, Ho, Wo)
    pt = pt.reshape(n, c * ksize * ksize, ho * wo)           # (N, C*k*k, Ho*Wo)
    pt = jnp.transpose(pt, (1, 0, 2)).reshape(c * ksize * ksize, n * ho * wo)
    return pt, ho, wo


# ----------------------------------------------------------------------------
# _SimpleSegmentationModel.forward  (aux_classifier=None -> returns 'out')
# ----------------------------------------------------------------------------
def simple_segmentation_forward(x, params):
    """Mirrors the PyTorch forward: returns the bilinearly-upsampled logits."""
    n, c_in, in_h, in_w = x.shape
    c_mid = params["bb_w"].shape[0]
    n_cls = params["cls_w"].shape[0]

    pt, ho, wo = _im2col_batch_folded(x, 3, 2, 1)             # (C_in*9, N*Ho*Wo)
    hw_in, hw_out = ho * wo, in_h * in_w

    # fold backbone bias into the patch matmul (ones row / bias column), bf16 ops
    ones_row = jnp.ones((1, pt.shape[1]), pt.dtype)
    pt_aug = jnp.concatenate([pt, ones_row], axis=0).astype(jnp.bfloat16)
    w1 = params["bb_w"].reshape(c_mid, c_in * 9)              # OIHW -> (O, I*k*k)
    w1_aug = jnp.concatenate(
        [w1, params["bb_b"].reshape(c_mid, 1)], axis=1).astype(jnp.bfloat16)
    w2 = params["cls_w"].reshape(n_cls, c_mid).astype(jnp.bfloat16)
    b2 = params["cls_b"].reshape(n_cls, 1).astype(jnp.float32)
    rt = jnp.asarray(_resize_matrix_t_np(in_h, in_w, ho, wo), jnp.bfloat16)

    out_t = _fused_forward(pt_aug, w1_aug, w2, b2, rt,
                           n_batch=n, hw_in=hw_in, hw_out=hw_out, n_cls=n_cls)
    # rows are ordered (n, c) -> free reshape back to NCHW
    return out_t.reshape(n, n_cls, in_h, in_w)


def init_params(key, c_in, c_mid, num_classes):
    k0, k1, k2, k3 = jax.random.split(key, 4)
    return {
        "bb_w": 0.1 * jax.random.normal(k0, (c_mid, c_in, 3, 3), jnp.float32),
        "bb_b": 0.1 * jax.random.normal(k1, (c_mid,), jnp.float32),
        "cls_w": 0.1 * jax.random.normal(k2, (num_classes, c_mid, 1, 1),
                                         jnp.float32),
        "cls_b": 0.1 * jax.random.normal(k3, (num_classes,), jnp.float32),
    }


# ----------------------------------------------------------------------------
# Pure-JAX reference (for validation only)
# ----------------------------------------------------------------------------
def _reference_forward(x, params):
    hp = jax.lax.Precision.HIGHEST
    feat = jax.lax.conv_general_dilated(
        x, params["bb_w"], window_strides=(2, 2), padding=((1, 1), (1, 1)),
        dimension_numbers=("NCHW", "OIHW", "NCHW"), precision=hp)
    feat = jnp.maximum(feat + params["bb_b"][None, :, None, None], 0.0)
    logits = jax.lax.conv_general_dilated(
        feat, params["cls_w"], window_strides=(1, 1), padding="VALID",
        dimension_numbers=("NCHW", "OIHW", "NCHW"), precision=hp)
    logits = logits + params["cls_b"][None, :, None, None]
    in_h, in_w = x.shape[-2:]
    a = jnp.asarray(_bilinear_matrix(in_h, feat.shape[-2]))
    b = jnp.asarray(_bilinear_matrix(in_w, feat.shape[-1]))
    return jnp.einsum("yh,nchw,xw->ncyx", a, logits, b, precision=hp)


if __name__ == "__main__":
    key = jax.random.PRNGKey(0)
    kx, kp = jax.random.split(key)

    N, C_IN, H, W = 2, 4, 16, 16
    C_MID, NUM_CLASSES = 8, 3

    x = jax.random.normal(kx, (N, C_IN, H, W), jnp.float32)   # NCHW input
    params = init_params(kp, C_IN, C_MID, NUM_CLASSES)

    fwd = jax.jit(simple_segmentation_forward)
    out = jax.block_until_ready(fwd(x, params))

    assert out.shape == (N, NUM_CLASSES, H, W), out.shape
    assert bool(jnp.all(jnp.isfinite(out)))

    ref_out = _reference_forward(x, params)
    assert bool(jnp.allclose(out, ref_out, atol=3e-2, rtol=3e-2)), \
        float(jnp.max(jnp.abs(out - ref_out)))

    print("KERNEL_OK")
</pallas_src>

<mosaic_0001>
module attributes {stable_mosaic.version = 11 : i64} {
  func.func @_fused_seg_kernel(%arg0: i32, %arg1: memref<37x128xbf16, #tpu.memory_space<vmem>>, %arg2: memref<8x37xbf16, #tpu.memory_space<vmem>>, %arg3: memref<3x8xbf16, #tpu.memory_space<vmem>>, %arg4: memref<3x1xf32, #tpu.memory_space<vmem>>, %arg5: memref<64x256xbf16, #tpu.memory_space<vmem>>, %arg6: memref<6x256xf32, #tpu.memory_space<vmem>>) attributes {dimension_semantics = [#tpu.dimension_semantics<arbitrary>], iteration_bounds = array<i64: 1>, scalar_prefetch = 0 : i64, scratch_operands = 0 : i64, tpu.core_type = #tpu.core_type<tc>, window_params = [{pipeline_mode = #tpu.pipeline_mode<synchronous>, transform_indices = @transform_0, window_bounds = array<i64: 37, 128>}, {pipeline_mode = #tpu.pipeline_mode<synchronous>, transform_indices = @transform_1, window_bounds = array<i64: 8, 37>}, {pipeline_mode = #tpu.pipeline_mode<synchronous>, transform_indices = @transform_2, window_bounds = array<i64: 3, 8>}, {pipeline_mode = #tpu.pipeline_mode<synchronous>, transform_indices = @transform_3, window_bounds = array<i64: 3, 1>}, {pipeline_mode = #tpu.pipeline_mode<synchronous>, transform_indices = @transform_4, window_bounds = array<i64: 64, 256>}, {pipeline_mode = #tpu.pipeline_mode<synchronous>, transform_indices = @transform_5, window_bounds = array<i64: 6, 256>}]} {
    %c0 = arith.constant 0 : index
    %c0_0 = arith.constant 0 : index
    %0 = vector.load %arg2[%c0, %c0_0] : memref<8x37xbf16, #tpu.memory_space<vmem>>, vector<8x37xbf16>
    %c0_1 = arith.constant 0 : index
    %c0_2 = arith.constant 0 : index
    %1 = vector.load %arg1[%c0_1, %c0_2] : memref<37x128xbf16, #tpu.memory_space<vmem>>, vector<37x128xbf16>
    %cst = arith.constant dense<0.000000e+00> : vector<8x128xf32>
    %2 = tpu.matmul %0, %1, %cst {dimension_numbers = #tpu.dot_dimension_numbers<[1], [0], [0], [1], [0, 0, 1, 1], [], []>} : vector<8x37xbf16>, vector<37x128xbf16>, vector<8x128xf32> -> vector<8x128xf32>
    %cst_3 = arith.constant 0.000000e+00 : f32
    %3 = vector.broadcast %cst_3 : f32 to vector<8x128xf32>
    %4 = arith.maximumf %2, %3 : vector<8x128xf32>
    %5 = arith.truncf %4 : vector<8x128xf32> to vector<8x128xbf16>
    %c0_4 = arith.constant 0 : index
    %c0_5 = arith.constant 0 : index
    %6 = vector.load %arg3[%c0_4, %c0_5] : memref<3x8xbf16, #tpu.memory_space<vmem>>, vector<3x8xbf16>
    %cst_6 = arith.constant dense<0.000000e+00> : vector<3x128xf32>
    %7 = tpu.matmul %6, %5, %cst_6 {dimension_numbers = #tpu.dot_dimension_numbers<[1], [0], [0], [1], [0, 0, 1, 1], [], []>} : vector<3x8xbf16>, vector<8x128xbf16>, vector<3x128xf32> -> vector<3x128xf32>
    %c0_7 = arith.constant 0 : index
    %c0_8 = arith.constant 0 : index
    %8 = vector.load %arg4[%c0_7, %c0_8] : memref<3x1xf32, #tpu.memory_space<vmem>>, vector<3x1xf32>
    %9 = vector.broadcast %8 : vector<3x1xf32> to vector<3x128xf32>
    %10 = arith.addf %7, %9 : vector<3x128xf32>
    %11 = vector.extract_strided_slice %10 {offsets = [0, 0], sizes = [3, 64], strides = [1, 1]} : vector<3x128xf32> to vector<3x64xf32>
    %12 = vector.extract_strided_slice %10 {offsets = [0, 64], sizes = [3, 64], strides = [1, 1]} : vector<3x128xf32> to vector<3x64xf32>
    %13 = tpu.concatenate %11, %12 in 0 : vector<3x64xf32>, vector<3x64xf32> -> vector<6x64xf32>
    %14 = arith.truncf %13 : vector<6x64xf32> to vector<6x64xbf16>
    %c0_9 = arith.constant 0 : index
    %c0_10 = arith.constant 0 : index
    %15 = vector.load %arg5[%c0_9, %c0_10] : memref<64x256xbf16, #tpu.memory_space<vmem>>, vector<64x256xbf16>
    %cst_11 = arith.constant dense<0.000000e+00> : vector<6x256xf32>
    %16 = tpu.matmul %14, %15, %cst_11 {dimension_numbers = #tpu.dot_dimension_numbers<[1], [0], [0], [1], [0, 0, 1, 1], [], []>} : vector<6x64xbf16>, vector<64x256xbf16>, vector<6x256xf32> -> vector<6x256xf32>
    %c0_12 = arith.constant 0 : index
    %c0_13 = arith.constant 0 : index
    %17 = vector.load %arg6[%c0_12, %c0_13] : memref<6x256xf32, #tpu.memory_space<vmem>>, vector<6x256xf32>
    tpu.vector_store %arg6[%c0_12, %c0_13], %16 {strides = array<i32>} : memref<6x256xf32, #tpu.memory_space<vmem>>, vector<6x256xf32>,
    return
  }
  func.func @transform_0(%arg0: i32) -> (i32, i32) {
    %c0_i32 = arith.constant 0 : i32
    %c0_i32_0 = arith.constant 0 : i32
    %c0_i32_1 = arith.constant 0 : i32
    return %c0_i32, %c0_i32_0 : i32, i32
  }
  func.func @transform_1(%arg0: i32) -> (i32, i32) {
    %c0_i32 = arith.constant 0 : i32
    %c0_i32_0 = arith.constant 0 : i32
    %c0_i32_1 = arith.constant 0 : i32
    return %c0_i32, %c0_i32_0 : i32, i32
  }
  func.func @transform_2(%arg0: i32) -> (i32, i32) {
    %c0_i32 = arith.constant 0 : i32
    %c0_i32_0 = arith.constant 0 : i32
    %c0_i32_1 = arith.constant 0 : i32
    return %c0_i32, %c0_i32_0 : i32, i32
  }
  func.func @transform_3(%arg0: i32) -> (i32, i32) {
    %c0_i32 = arith.constant 0 : i32
    %c0_i32_0 = arith.constant 0 : i32
    %c0_i32_1 = arith.constant 0 : i32
    return %c0_i32, %c0_i32_0 : i32, i32
  }
  func.func @transform_4(%arg0: i32) -> (i32, i32) {
    %c0_i32 = arith.constant 0 : i32
    %c0_i32_0 = arith.constant 0 : i32
    %c0_i32_1 = arith.constant 0 : i32
    return %c0_i32, %c0_i32_0 : i32, i32
  }
  func.func @transform_5(%arg0: i32) -> (i32, i32) {
    %c0_i32 = arith.constant 0 : i32
    %c0_i32_0 = arith.constant 0 : i32
    %c0_i32_1 = arith.constant 0 : i32
    return %c0_i32, %c0_i32_0 : i32, i32
  }
}

</mosaic_0001>

<bundles_post_ra>
// kernel: simple_segmentation_forward.1
= control target key start
LH: loop header
LB: loop body
LE: loop exit
PB: predicated region body
PF: predicated region fallthrough
CT: control target
= control target key end

     0   :  { %vm46_vm0 = vcmask 1041408   ;;  %vm47_vm1 = vcmask 1042432   ;;  %v313_v0 = vmov 0.0   ;;  %v314_v2 = vmov 65535   ;;  %s317_s17 = smov 64   ;;  %s398_s0 = inlined_call_operand.vmem [shape: bf16[37,128], index: 0, kind: input, shape index: {}]   ;;  %s399_s1 = inlined_call_operand.vmem [shape: bf16[8,37], index: 1, kind: input, shape index: {}]   ;;  %s400_s3 = inlined_call_operand.vmem [shape: f32[3,1], index: 3, kind: input, shape index: {}]   ;;  %s401_s2 = inlined_call_operand.vmem [shape: bf16[3,8], index: 2, kind: input, shape index: {}]   ;;  %s402_s4 = inlined_call_operand.vmem [shape: bf16[64,256], index: 4, kind: input, shape index: {}]   ;;  %s403_s5 = inlined_call_operand.vmem [shape: f32[6,256], index: 5, kind: output, shape index: {}]  }
   0x1   :  { %276 = vmatprep.subr.bf16.mxu0 %v313_v0  ;;  %v298_v1 = vld [vmem:[%s398_s0] sm:$0xff]   ;;  %v48_v3 = vsel %vm46_vm0, 4294967295, %v314_v2  ;;  %286 = vmatprep.subr.bf16.mxu1 %v313_v0  ;;  %v299_v4 = vld [vmem:[%s398_s0 + $0x8] sm:$0xff]   ;;  %v300_v5 = vld [vmem:[%s398_s0 + $0x10] ss:$0 sps:$4 sm:$0x77]  }
   0x2   :  { %277 = vmatpush3.bf16.msra.mxu0 %v298_v1  ;;  %v49_v6 = vsel %vm47_vm1, %v48_v3, 0  ;;  %vm315_vm2 = vmmov 0   ;;  %v21_v8 = vld [vmem:[%s399_s1] sm:$0xf]  ;;  %vm42_vm3 = vcmask 302080   ;;  %v316_v9 = vmov 0  }
   0x3   :  { %278 = vmatprep.subr.bf16.mxu0 %v313_v0  ;;  %282 = vmatprep.mubr.msk.bf16.mxu0 %vm315_vm2, %v313_v0  ;;  %v51_v7 = vand.u32 %v300_v5, %v49_v6  ;;  %v96_v10 = vld [vmem:[%s400_s3] sm:$0x7]  ;;  %vm106_vm4 = vcmask 1043456   ;;  %vm102_vm5 = vcmask 64512   ;;  %v303_v20 = vld [vmem:[%s402_s4 + $0x4] ss:$8 sps:$4 sm:$0xff]  }
   0x4   :  { %288 = vmatprep.mubr.msk.bf16.mxu1 %vm315_vm2, %v313_v0  ;;  %297 = vset.pattern.permute.xlu0 %v316_v9  ;;  %v95_v18 = vld [vmem:[%s401_s2] sm:$0x3]  ;;  %v306_v21 = vld [vmem:[%s402_s4 + $0x14] ss:$8 sps:$4 sm:$0xff]   ;;  %v304_v22 = vld [vmem:[%s402_s4 + $0x10] ss:$8 sps:$4 sm:$0xff]  }
   0x5   :  { %99 = vperm.xlu0 %297, %v96_v10   ;;  %v301_v19 = vld [vmem:[%s402_s4] ss:$8 sps:$4 sm:$0xff]   ;;  %v309_v23 = vld [vmem:[%s402_s4 + $0x24] ss:$8 sps:$4 sm:$0xff]   ;;  %v312_v25 = vld [vmem:[%s402_s4 + $0x34] ss:$8 sps:$4 sm:$0xff]  }
   0x6   :  { %279 = vmatpush3.bf16.msra.mxu0 %v299_v4  ;;  %v307_v24 = vld [vmem:[%s402_s4 + $0x20] ss:$8 sps:$4 sm:$0xff]   ;;  %v310_v26 = vld [vmem:[%s402_s4 + $0x30] ss:$8 sps:$4 sm:$0xff]   ;;  %vm205_vm6 = vcmask 523264  }
   0x7   :  { %280 = vmatprep.subr.bf16.mxu0 %v313_v0 }
   0xa   :  { %281 = vmatpush3.bf16.msra.mxu0 %v51_v7 }
   0xd   :  { %283 = vmatmul.mubr.msk.bf16.vlgmr.msra.gmra.mrb[0].mxu0 %vm42_vm3, %v21_v8 }
  0x84   :  { %v100_v27 = vpop.permute.xlu0 %99 }
  0xe0   :  { %v87_v11 = vpop.f32.mrb[0].mxu0 }
  0xe1   :  { %v93_v12 = vmax.f32 %v87_v11, 0.0  ;;  %v284_v13 = vpop.f32.mrb[1].mxu0 }
  0xe2   :  { %v90_v14 = vpop.f32.mrb[2].mxu0 }
  0xe3   :  { %v94_v15 = vpack.c.bf16 %v93_v12, %v93_v12  ;;  %v285_v16 = vpop.f32.mrb[3].mxu0 }
  0xe5   :  { %v108_v17 = vsel %vm106_vm4, %v94_v15, 0 }
  0xe6   :  { %287 = vmatpush3.bf16.msra.mxu1 %v108_v17 }
  0xe7   :  { %209 = vmatprep.subr.bf16.mxu1 %v303_v20 }
  0xe9   :  { %289 = vmatmul.mubr.msk.bf16.vlgmr.msra.gmra.mrb[0].mxu1 %vm102_vm5, %v95_v18 }
  0xea   :  { %241 = vmatprep.mubr.bf16.mxu1 %v316_v9  ;;  %210 = vmatpush1.bf16.msra.mxu1 %v301_v19 }
  0xeb   :  { %211 = vmatprep.subr.bf16.mxu1 %v306_v21 }
  0xee   :  { %212 = vmatpush1.bf16.msra.mxu1 %v304_v22 }
  0xef   :  { %213 = vmatprep.subr.bf16.mxu1 %v309_v23 }
  0xf2   :  { %214 = vmatpush1.bf16.msra.mxu1 %v307_v24 }
  0xf3   :  { %215 = vmatprep.subr.bf16.mxu1 %v312_v25 }
  0xf6   :  { %216 = vmatpush1.bf16.msra.mxu1 %v310_v26 }
 0x1bc   :  { %v144_v28 = vpop.f32.mrb[0].mxu1 }
 0x1bd   :  { %v145_v29 = vadd.f32 %v144_v28, %v100_v27  ;;  %v290_v30 = vpop.f32.mrb[1].mxu1 }
 0x1be   :  { %v147_v31 = vpop.f32.mrb[2].mxu1 }
 0x1bf   :  { %v151_v32 = vrot.slane %v145_v29, 5  ;;  %v291_v33 = vpop.f32.mrb[3].mxu1 }
 0x1c1   :  { %152 = vrot.lane.b32.xlu0 %v151_v32, %s317_s17 }
 0x233   :  { %v153_v34 = vpop.permute.xlu0 %152 }
 0x234   :  { %v155_v35 = vsel %vm47_vm1, %v145_v29, %v153_v34 }
 0x235   :  { %v156_v36 = vpack.c.bf16 %v155_v35, %v155_v35 }
 0x237   :  { %269 = vmatmul.mubr.msk.bf16.vlgmr.msra.gmra.mrb[4].mxu1 %vm205_vm6, %v156_v36 }
 0x30a   :  { %v243_v37 = vpop.f32.mrb[4].mxu1 }
 0x30b   :  { %250 = vst [vmem:[%s403_s5] sm:$0x3f] %v243_v37  ;;  %v245_v38 = vpop.f32.mrb[5].mxu1 }
 0x30c   :  { %251 = vst [vmem:[%s403_s5 + $0x8] sm:$0x3f] %v245_v38  ;;  %v247_v39 = vpop.f32.mrb[6].mxu1 }
 0x30d   :  { %v248_v40 = vpop.f32.mrb[7].mxu1 }

</bundles_post_ra>
